<compile_context>
chip_gen: v6e
topology: v6e:2x2x1
jax: 0.10.0
libtpu: 0.0.40
codegen_flags: <defaults>
</compile_context>

<pallas_src>
import jax
import jax.numpy as jnp
from jax import lax
from jax.experimental import pallas as pl
from jax.experimental.pallas import tpu as pltpu

N, CIN, D, H, W = 2, 1, 8, 4, 7
COUT = 32
K = 3
NDH = N * D * H  # number of summed output positions per (channel, w)


def conv_sum_kernel(x_ref, w_ref, out_ref):
    # x_ref  : (N*D, H*W) = (16, 28) f32, rows = n*D + d, cols = h*W + w
    # w_ref  : (COUT, K*K*K + 1) = (32, 28) augmented weight:
    #          col t = kw*9 + kh*3 + kd holds weight[c, 0, kd, kh, kw];
    #          col 27 holds bias[c]*N*D*H - 0.5.
    # out_ref: (COUT, W) = (32, 7)
    x2 = x_ref[...]

    # --- batch (N) reduction, hoisted out of the tap computation ------------
    xs = x2[0:D, :] + x2[D:2 * D, :]                    # (8, 28), rows = d

    # --- D-window sums: full sum + inclusion-exclusion corrections ----------
    p = jnp.sum(xs, axis=0, keepdims=True)              # (1, 28) sum over d
    a0 = p - xs[D - 1:D, :]                             # kd=0: drop last d
    a2 = p - xs[0:1, :]                                 # kd=2: drop first d
    A = jnp.concatenate([a0, p, a2], axis=0)            # (3, 28), rows = kd

    # --- H-window sums (lanes are h*W + w): lane-group add + corrections ----
    h0 = A[:, 0 * W:1 * W]
    h1 = A[:, 1 * W:2 * W]
    h2 = A[:, 2 * W:3 * W]
    h3 = A[:, 3 * W:4 * W]
    hf = (h0 + h1) + (h2 + h3)                          # (3, 7) full sum over h
    b0 = hf - h3                                        # kh=0: drop last h
    b2 = hf - h0                                        # kh=2: drop first h
    B = jnp.concatenate([b0, hf, b2], axis=0)           # (9, 7), rows = kh*3+kd

    # --- kw variants: lane shifts with zero halo, done as tiny MXU matmuls --
    ri = lax.broadcasted_iota(jnp.int32, (W, W), 0)
    ci = lax.broadcasted_iota(jnp.int32, (W, W), 1)
    s0 = (ri + 1 == ci).astype(jnp.float32)             # shift right, zero col 0
    s2 = (ri == ci + 1).astype(jnp.float32)             # shift left, zero last col
    t0 = jnp.dot(B, s0, preferred_element_type=jnp.float32)   # kw=0 taps
    t2 = jnp.dot(B, s2, preferred_element_type=jnp.float32)   # kw=2 taps

    # taps row index = kw*9 + kh*3 + kd; last row = 1 (bias / -0.5 column).
    taps = jnp.concatenate(
        [t0, B, t2, jnp.ones((1, W), jnp.float32)], axis=0)   # (28, 7)

    # --- single main MXU matmul, already in final (COUT, W) layout ----------
    out_ref[...] = jnp.dot(w_ref[...], taps,
                           preferred_element_type=jnp.float32)


def prepare_params(weight, bias):
    """One-time param prep (outside the per-call path): permute the conv
    weight to the kernel's tap order and fold (bias*N*D*H - 0.5) into an
    extra column so bias/offset ride the single MXU matmul."""
    w = weight.astype(jnp.float32).reshape(COUT, K, K, K)     # (c, kd, kh, kw)
    w_perm = jnp.transpose(w, (0, 3, 2, 1)).reshape(COUT, K * K * K)  # kw*9+kh*3+kd
    bcol = (bias.astype(jnp.float32) * jnp.float32(NDH)
            - jnp.float32(0.5)).reshape(COUT, 1)
    return jnp.concatenate([w_perm, bcol], axis=1)            # (32, 28)


@jax.jit
def model_forward(x, w_aug):
    # x: (N, CIN, D, H, W); w_aug: (COUT, 28) from prepare_params.
    x2 = x.astype(jnp.float32).reshape(N * D, H * W)          # (16, 28), free reshape
    return pl.pallas_call(
        conv_sum_kernel,
        out_shape=jax.ShapeDtypeStruct((COUT, W), jnp.float32),
        in_specs=[
            pl.BlockSpec(memory_space=pltpu.MemorySpace.VMEM),
            pl.BlockSpec(memory_space=pltpu.MemorySpace.VMEM),
        ],
        out_specs=pl.BlockSpec(memory_space=pltpu.MemorySpace.VMEM),
    )(x2, w_aug)   # (32, 7) == v1.sum(dim=[0,2,3]) - 0.5


def reference_forward(x, weight, bias):
    # Pure-JAX reference via lax.conv_general_dilated for validation.
    v1 = lax.conv_general_dilated(
        x.astype(jnp.float32), weight.astype(jnp.float32),
        window_strides=(1, 1, 1), padding=((1, 1), (1, 1), (1, 1)),
        dimension_numbers=("NCDHW", "OIDHW", "NCDHW"))
    v1 = v1 + bias.reshape(1, COUT, 1, 1, 1)
    return v1.sum(axis=(0, 2, 3)) - 0.5


if __name__ == "__main__":
    key = jax.random.PRNGKey(0)
    kx, kw_, kb = jax.random.split(key, 3)

    x = jax.random.normal(kx, (N, CIN, D, H, W), dtype=jnp.float32)

    # Deterministic Conv3d-style init: uniform(-1/sqrt(fan_in), 1/sqrt(fan_in))
    fan_in = CIN * K * K * K
    bound = 1.0 / (fan_in ** 0.5)
    weight = jax.random.uniform(kw_, (COUT, CIN, K, K, K),
                                minval=-bound, maxval=bound, dtype=jnp.float32)
    bias = jax.random.uniform(kb, (COUT,), minval=-bound, maxval=bound,
                              dtype=jnp.float32)

    w_aug = prepare_params(weight, bias)   # one-time param prep, not per call

    out = jax.block_until_ready(model_forward(x, w_aug))
    ref = jax.block_until_ready(reference_forward(x, weight, bias))

    assert out.shape == (COUT, W), out.shape
    assert jnp.allclose(out, ref, atol=1e-4, rtol=1e-4), (
        float(jnp.max(jnp.abs(out - ref))))
    print("KERNEL_OK")
</pallas_src>

<mosaic_0001>
module attributes {stable_mosaic.version = 11 : i64} {
  func.func @conv_sum_kernel(%arg0: memref<16x28xf32, #tpu.memory_space<vmem>>, %arg1: memref<32x28xf32, #tpu.memory_space<vmem>>, %arg2: memref<32x7xf32, #tpu.memory_space<vmem>>) attributes {dimension_semantics = [], scalar_prefetch = 0 : i64, scratch_operands = 0 : i64, tpu.core_type = #tpu.core_type<tc>} {
    %c0 = arith.constant 0 : index
    %c0_0 = arith.constant 0 : index
    %0 = vector.load %arg0[%c0, %c0_0] : memref<16x28xf32, #tpu.memory_space<vmem>>, vector<16x28xf32>
    %1 = vector.extract_strided_slice %0 {offsets = [0, 0], sizes = [8, 28], strides = [1, 1]} : vector<16x28xf32> to vector<8x28xf32>
    %2 = vector.extract_strided_slice %0 {offsets = [8, 0], sizes = [8, 28], strides = [1, 1]} : vector<16x28xf32> to vector<8x28xf32>
    %3 = arith.addf %1, %2 : vector<8x28xf32>
    %cst = arith.constant dense<0.000000e+00> : vector<28xf32>
    %4 = vector.multi_reduction <add>, %3, %cst [0] : vector<8x28xf32> to vector<28xf32>
    %5 = vector.shape_cast %4 : vector<28xf32> to vector<1x28xf32>
    %6 = vector.extract_strided_slice %3 {offsets = [7, 0], sizes = [1, 28], strides = [1, 1]} : vector<8x28xf32> to vector<1x28xf32>
    %7 = arith.subf %5, %6 : vector<1x28xf32>
    %8 = vector.extract_strided_slice %3 {offsets = [0, 0], sizes = [1, 28], strides = [1, 1]} : vector<8x28xf32> to vector<1x28xf32>
    %9 = arith.subf %5, %8 : vector<1x28xf32>
    %10 = tpu.concatenate %7, %5, %9 in 0 : vector<1x28xf32>, vector<1x28xf32>, vector<1x28xf32> -> vector<3x28xf32>
    %11 = vector.extract_strided_slice %10 {offsets = [0, 0], sizes = [3, 7], strides = [1, 1]} : vector<3x28xf32> to vector<3x7xf32>
    %12 = vector.extract_strided_slice %10 {offsets = [0, 7], sizes = [3, 7], strides = [1, 1]} : vector<3x28xf32> to vector<3x7xf32>
    %13 = vector.extract_strided_slice %10 {offsets = [0, 14], sizes = [3, 7], strides = [1, 1]} : vector<3x28xf32> to vector<3x7xf32>
    %14 = vector.extract_strided_slice %10 {offsets = [0, 21], sizes = [3, 7], strides = [1, 1]} : vector<3x28xf32> to vector<3x7xf32>
    %15 = arith.addf %11, %12 : vector<3x7xf32>
    %16 = arith.addf %13, %14 : vector<3x7xf32>
    %17 = arith.addf %15, %16 : vector<3x7xf32>
    %18 = arith.subf %17, %14 : vector<3x7xf32>
    %19 = arith.subf %17, %11 : vector<3x7xf32>
    %20 = tpu.concatenate %18, %17, %19 in 0 : vector<3x7xf32>, vector<3x7xf32>, vector<3x7xf32> -> vector<9x7xf32>
    %21 = tpu.iota {dimensions = array<i32: 0>} : vector<7x7xi32>
    %22 = tpu.iota {dimensions = array<i32: 1>} : vector<7x7xi32>
    %c1_i32 = arith.constant 1 : i32
    %23 = vector.broadcast %c1_i32 : i32 to vector<7x7xi32>
    %24 = arith.addi %21, %23 : vector<7x7xi32>
    %25 = arith.cmpi eq, %24, %22 : vector<7x7xi32>
    %26 = arith.extui %25 : vector<7x7xi1> to vector<7x7xi32>
    %27 = arith.sitofp %26 : vector<7x7xi32> to vector<7x7xf32>
    %c1_i32_1 = arith.constant 1 : i32
    %28 = vector.broadcast %c1_i32_1 : i32 to vector<7x7xi32>
    %29 = arith.addi %22, %28 : vector<7x7xi32>
    %30 = arith.cmpi eq, %21, %29 : vector<7x7xi32>
    %31 = arith.extui %30 : vector<7x7xi1> to vector<7x7xi32>
    %32 = arith.sitofp %31 : vector<7x7xi32> to vector<7x7xf32>
    %cst_2 = arith.constant dense<0.000000e+00> : vector<9x7xf32>
    %33 = tpu.matmul %20, %27, %cst_2 {dimension_numbers = #tpu.dot_dimension_numbers<[1], [0], [0], [1], [0, 0, 1, 1], [], []>} : vector<9x7xf32>, vector<7x7xf32>, vector<9x7xf32> -> vector<9x7xf32>
    %cst_3 = arith.constant dense<0.000000e+00> : vector<9x7xf32>
    %34 = tpu.matmul %20, %32, %cst_3 {dimension_numbers = #tpu.dot_dimension_numbers<[1], [0], [0], [1], [0, 0, 1, 1], [], []>} : vector<9x7xf32>, vector<7x7xf32>, vector<9x7xf32> -> vector<9x7xf32>
    %cst_4 = arith.constant 1.000000e+00 : f32
    %35 = vector.broadcast %cst_4 : f32 to vector<1x7xf32>
    %36 = tpu.concatenate %33, %20, %34, %35 in 0 : vector<9x7xf32>, vector<9x7xf32>, vector<9x7xf32>, vector<1x7xf32> -> vector<28x7xf32>
    %c0_5 = arith.constant 0 : index
    %c0_6 = arith.constant 0 : index
    %37 = vector.load %arg1[%c0_5, %c0_6] : memref<32x28xf32, #tpu.memory_space<vmem>>, vector<32x28xf32>
    %cst_7 = arith.constant dense<0.000000e+00> : vector<32x7xf32>
    %38 = tpu.matmul %37, %36, %cst_7 {dimension_numbers = #tpu.dot_dimension_numbers<[1], [0], [0], [1], [0, 0, 1, 1], [], []>} : vector<32x28xf32>, vector<28x7xf32>, vector<32x7xf32> -> vector<32x7xf32>
    %c0_8 = arith.constant 0 : index
    %c0_9 = arith.constant 0 : index
    %39 = vector.load %arg2[%c0_8, %c0_9] : memref<32x7xf32, #tpu.memory_space<vmem>>, vector<32x7xf32>
    tpu.vector_store %arg2[%c0_8, %c0_9], %38 {strides = array<i32>} : memref<32x7xf32, #tpu.memory_space<vmem>>, vector<32x7xf32>,
    return
  }
}

</mosaic_0001>

<bundles_post_ra>
// kernel: model_forward.1
= control target key start
LH: loop header
LB: loop body
LE: loop exit
PB: predicated region body
PF: predicated region fallthrough
CT: control target
= control target key end

     0   :  { %vm14_vm0 = vcmask 228352   ;;  %vm28_vm1 = vcmask 1040384   ;;  %vm30_vm2 = vcmask 1041408   ;;  %s424_s13 = smov 107   ;;  %v57_v15 = vlaneseq  ;;  %s426_s14 = smov 114   ;;  %s493_s0 = inlined_call_operand.vmem [shape: f32[16,28], index: 0, kind: input, shape index: {}]   ;;  %s494_s1 = inlined_call_operand.vmem [shape: f32[32,28], index: 1, kind: input, shape index: {}]   ;;  %s495_s2 = inlined_call_operand.vmem [shape: f32[32,7], index: 2, kind: output, shape index: {}]  }
   0x1   :  { %v11_v0 = vld [vmem:[%s493_s0] sm:$0xff]  ;;  %v12_v1 = vld [vmem:[%s493_s0 + $0x8] sm:$0xff]  ;;  %s423_s0 = smov 121   ;;  %vm75_vm4 = vcmask 1046528   ;;  %v425_v20 = vmov 0.0   ;;  %vm53_vm6 = vcmask 1042432  }
   0x2   :  { %v13_v2 = vadd.f32 %v12_v1, %v11_v0  ;;  %v58_v16 = vshrl.u32 %v57_v15, 7  ;;  %v60_v17 = vand.u32 127, %v57_v15  ;;  %vm55_vm7 = vcmask 1045504   ;;  %v247_v37 = vld [vmem:[%s494_s1] sm:$0xff]  ;;  %v249_v38 = vld [vmem:[%s494_s1 + $0x10] sm:$0xff]  ;;  %v248_v49 = vld [vmem:[%s494_s1 + $0x8] sm:$0xff] }
   0x3   :  { %vm69_vm8 = vcmask 56320   ;;  %vm263_vm9 = vcmask 1043456   ;;  %v250_v50 = vld [vmem:[%s494_s1 + $0x18] sm:$0xff] }
   0x4   :  { %v15_v3 = vsel %vm14_vm0, %v13_v2, 0.0  ;;  %v61_v18 = vadd.s32 1, %v58_v16  ;;  %v65_v19 = vadd.s32 1, %v60_v17 }
   0x5   :  { %v16_v4 = vrot.slane %v15_v3, 4 }
   0x6   :  { %vm62_vm3 = vcmp.eq.s32.totalorder %v61_v18, %v60_v17  ;;  %vm66_vm5 = vcmp.eq.s32.totalorder %v58_v16, %v65_v19 }
   0x7   :  { %v17_v5 = vadd.f32 %v16_v4, %v15_v3  ;;  %v360_v21 = vsel %vm62_vm3, 1.0, %v425_v20  ;;  %v361_v22 = vsel %vm66_vm5, 1.0, %v425_v20 }
   0x8   :  { %387 = vmatprep.subr.msk.mxu0 %vm75_vm4, %v360_v21  ;;  %392 = vmatprep.subr.msk.mxu1 %vm75_vm4, %v361_v22 }
   0x9   :  { %v18_v6 = vrot.slane %v17_v5, 2  ;;  %388 = vmatpush3.msk.msra.mxu0 %vm75_vm4, %v360_v21  ;;  %393 = vmatpush3.msk.msra.mxu1 %vm75_vm4, %v361_v22 }
   0xb   :  { %v19_v7 = vadd.f32 %v18_v6, %v17_v5 }
   0xd   :  { %v20_v8 = vrot.slane %v19_v7, 1 }
   0xf   :  { %v21_v9 = vadd.f32 %v20_v8, %v19_v7 }
  0x11   :  { %v22_v10 = vsub.f32 %v21_v9, %v13_v2 }
  0x13   :  { %v24_v11 = vrot.slane %v22_v10, 7  ;;  %v26_v12 = vrot.slane %v22_v10, 6 }
  0x15   :  { %v29_v13 = vsel %vm28_vm1, %v24_v11, %v21_v9 }
  0x16   :  { %v31_v14 = vsel %vm30_vm2, %v29_v13, %v26_v12 }
  0x17   :  { %33 = vrot.lane.b32.xlu0 %v31_v14, %s423_s0  ;;  %42 = vrot.lane.b32.xlu1 %v31_v14, %s424_s13 }
  0x89   :  { %v34_v23 = vpop.permute.xlu0 %33  ;;  %v43_v26 = vpop.permute.xlu1 %42 }
  0x8a   :  { %v36_v24 = vadd.f32 %v34_v23, %v31_v14 }
  0x8c   :  { %38 = vrot.lane.b32.xlu0 %v36_v24, %s426_s14 }
  0xfe   :  { %v39_v25 = vpop.permute.xlu0 %38 }
  0xff   :  { %v41_v27 = vadd.f32 %v39_v25, %v36_v24 }
 0x101   :  { %v46_v28 = vsub.f32 %v41_v27, %v31_v14  ;;  %v48_v29 = vrot.slane %v41_v27, 5  ;;  %v45_v30 = vsub.f32 %v41_v27, %v43_v26 }
 0x103   :  { %v51_v31 = vrot.slane %v46_v28, 2  ;;  %v54_v32 = vsel %vm53_vm6, %v45_v30, %v48_v29 }
 0x105   :  { %v56_v33 = vsel %vm55_vm7, %v54_v32, %v51_v31  ;;  %v233_v34 = vrot.slane %v51_v31, 7 }
 0x106   :  { %389 = vmatprep.mubr.msk.f32.mxu0 %vm69_vm8, %v56_v33  ;;  %v232_v35 = vrot.slane %v56_v33, 7  ;;  %394 = vmatprep.mubr.msk.f32.mxu1 %vm69_vm8, %v56_v33 }
 0x107   :  { %390 = vmatmul.mubr.msk.f32.vlgmr.msra.gmra.mxu0 %vm69_vm8, %v51_v31  ;;  %395 = vmatmul.mubr.msk.f32.vlgmr.msra.gmra.mxu1 %vm69_vm8, %v51_v31 }
 0x108   :  { %v234_v36 = vsel %vm28_vm1, %v232_v35, %v233_v34  ;;  %405 = vmatprep.mubr.msk.f32.mxu0 %vm14_vm0, %v247_v37  ;;  %408 = vmatprep.mubr.msk.f32.mxu1 %vm14_vm0, %v249_v38 }
 0x1c7   :  { %v396_v39 = vpop.f32.mrf.mxu1  ;;  %v391_v45 = vpop.f32.mrf.mxu0 }
 0x1c8   :  { %v240_v41 = vrot.slane %v396_v39, 6  ;;  %v244_v47 = vsel %vm28_vm1, %v391_v45, %v232_v35 }
 0x1c9   :  { %v223_v40 = vpop.f32.mrf.mxu1  ;;  %v145_v48 = vpop.f32.mrf.mxu0 }
 0x1ca   :  { %v239_v42 = vrot.slane %v223_v40, 6 }
 0x1cc   :  { %v241_v43 = vsel %vm30_vm2, %v239_v42, %v240_v41  ;;  %v245_v46 = vsel %vm30_vm2, %v234_v36, %v239_v42 }
 0x1cd   :  { %v246_v44 = vsel %vm53_vm6, %v241_v43, 1.0 }
 0x1ce   :  { %397 = vmatprep.subr.msk.mxu0 %vm263_vm9, %v246_v44  ;;  %411 = vmatprep.subr.msk.mxu1 %vm263_vm9, %v246_v44 }
 0x1cf   :  { %398 = vmatpush3.msk.msra.mxu0 %vm263_vm9, %v246_v44  ;;  %415 = vmatpush3.msk.msra.mxu1 %vm263_vm9, %v246_v44 }
 0x1d0   :  { %399 = vmatprep.subr.mxu0 %v245_v46  ;;  %412 = vmatprep.subr.mxu1 %v245_v46 }
 0x1d1   :  { %400 = vmatpush3.msra.mxu0 %v245_v46  ;;  %416 = vmatpush3.msra.mxu1 %v245_v46 }
 0x1d2   :  { %401 = vmatprep.subr.mxu0 %v244_v47  ;;  %413 = vmatprep.subr.mxu1 %v244_v47 }
 0x1d3   :  { %402 = vmatpush3.msra.mxu0 %v244_v47  ;;  %417 = vmatpush3.msra.mxu1 %v244_v47 }
 0x1d4   :  { %403 = vmatprep.subr.mxu0 %v145_v48  ;;  %414 = vmatprep.subr.mxu1 %v145_v48 }
 0x1d5   :  { %404 = vmatpush3.msra.mxu0 %v145_v48  ;;  %418 = vmatpush3.msra.mxu1 %v145_v48 }
 0x1d6   :  { %406 = vmatmul.mubr.msk.f32.vlgmr.msra.gmra.mxu0 %vm14_vm0, %v248_v49  ;;  %409 = vmatmul.mubr.msk.f32.vlgmr.msra.gmra.mxu1 %vm14_vm0, %v250_v50 }
 0x296   :  { %v407_v51 = vpop.f32.mrf.mxu0  ;;  %v410_v52 = vpop.f32.mrf.mxu1 }
 0x297   :  { %353 = vst.msk [vmem:[%s495_s2 + $0x8] sm:$0xff] %vm69_vm8, %v407_v51  ;;  %355 = vst.msk [vmem:[%s495_s2 + $0x18] sm:$0xff] %vm69_vm8, %v410_v52 }
 0x298   :  { %v333_v53 = vpop.f32.mrf.mxu0  ;;  %v343_v54 = vpop.f32.mrf.mxu1 }
 0x299   :  { %352 = vst.msk [vmem:[%s495_s2] sm:$0xff] %vm69_vm8, %v333_v53  ;;  %354 = vst.msk [vmem:[%s495_s2 + $0x10] sm:$0xff] %vm69_vm8, %v343_v54 }

</bundles_post_ra>
